<compile_context>
chip_gen: v5e
topology: v5e:2x2
jax: 0.10.0
libtpu: 0.0.40
codegen_flags: <defaults>
</compile_context>

<pallas_src>
import functools

import jax
import jax.numpy as jnp
from jax.experimental import pallas as pl
from jax.experimental.pallas import tpu as pltpu


def _round_up(a, m):
    return (a + m - 1) // m * m


def dqn_kernel(x_ref, w1_ref, b1_ref, w2_ref, b2_ref, w3_ref, b3_ref, o_ref):
    # Three fused MXU matmuls (bf16 operands, f32 accumulation) + f32 VPU bias/ReLU.
    h1 = jnp.dot(x_ref[...], w1_ref[...], preferred_element_type=jnp.float32) + b1_ref[...]
    h1 = jnp.maximum(h1, 0.0)                                   # f32 on VPU
    h2 = jnp.dot(h1.astype(jnp.bfloat16), w2_ref[...],
                 preferred_element_type=jnp.float32) + b2_ref[...]
    h2 = jnp.maximum(h2, 0.0)                                   # f32 on VPU
    # Output tile is (TB, 128) bf16: lane-dense, unmasked stores, halved writeback.
    q = jnp.dot(h2.astype(jnp.bfloat16), w3_ref[...],
                preferred_element_type=jnp.float32) + b3_ref[...]
    o_ref[...] = q.astype(o_ref.dtype)


@functools.partial(jax.jit, static_argnames=("block_batch",))
def dqn_forward(x, params, *, block_batch=512):
    w1, b1, w2, b2, w3, b3 = params
    batch, state_dim = x.shape
    hidden = w1.shape[1]
    action_dim = w3.shape[1]

    LANES = 128
    SUB = 16  # bf16 packs 2 rows per sublane -> keep batch tiles on 16-row boundaries
    out_pad = _round_up(max(action_dim, LANES), LANES)  # 5 -> 128: lane-dense store

    # Pad the last layer's output features with zeros (wrapper slices them off).
    w3p = jnp.zeros((hidden, out_pad), jnp.float32).at[:, :action_dim].set(w3)
    b3p = jnp.zeros((1, out_pad), jnp.float32).at[:, :action_dim].set(b3)

    # bf16 MXU operands; biases stay f32 (added after the f32-accumulated dot).
    w1b = w1.astype(jnp.bfloat16)
    w2b = w2.astype(jnp.bfloat16)
    w3b = w3p.astype(jnp.bfloat16)

    # Batch tiling:
    #  - 16-row granularity (bf16 sublane packing),
    #  - >=2 tiles whenever possible so v7x's two TensorCores both get work,
    #  - tile capped at block_batch (default 512 >= 256 -> fills v6e/v7x 256-row MXU).
    block_batch = max(SUB, _round_up(block_batch, SUB))
    b_pad = _round_up(batch, SUB)
    if b_pad >= 2 * SUB:
        tb = min(block_batch, _round_up(pl.cdiv(b_pad, 2), SUB))
    else:
        tb = b_pad
    b_pad = _round_up(b_pad, tb)

    if b_pad != batch:
        x = jnp.pad(x, ((0, b_pad - batch), (0, 0)))
    # Stream activations as bf16 (half the input DMA bytes, no in-kernel cast).
    x_bf16 = x.astype(jnp.bfloat16)

    grid = (b_pad // tb,)
    resident = lambda arr: pl.BlockSpec(arr.shape, lambda i: (0, 0))  # stays in VMEM

    # Advisory cost model (per full call, padded shapes).
    flops = 2 * b_pad * (state_dim * hidden + hidden * hidden + hidden * out_pad)
    bytes_accessed = (
        b_pad * state_dim * 2                                    # bf16 input stream
        + b_pad * out_pad * 2                                    # bf16 output stream
        + (state_dim * hidden + hidden * hidden + hidden * out_pad) * 2  # bf16 weights
        + (hidden + hidden + out_pad) * 4                        # f32 biases
    )
    cost = pl.CostEstimate(flops=flops, transcendentals=0, bytes_accessed=bytes_accessed)

    out = pl.pallas_call(
        dqn_kernel,
        out_shape=jax.ShapeDtypeStruct((b_pad, out_pad), jnp.bfloat16),
        grid=grid,
        in_specs=[
            pl.BlockSpec((tb, state_dim), lambda i: (i, 0)),     # activation stream
            resident(w1b), resident(b1),
            resident(w2b), resident(b2),
            resident(w3b), resident(b3p),
        ],
        out_specs=pl.BlockSpec((tb, out_pad), lambda i: (i, 0)),
        compiler_params=pltpu.CompilerParams(
            dimension_semantics=("parallel",),                   # v7x: 2 TCs split tiles
        ),
        cost_estimate=cost,
    )(x_bf16, w1b, b1, w2b, b2, w3b, b3p)

    # Slice off batch/lane padding; return f32 Q-values for PyTorch-API parity.
    return out[:batch, :action_dim].astype(jnp.float32)


def init_params(key, state_dim=18, hidden=256, action_dim=5):
    # Deterministic PyTorch-nn.Linear-style init: U(-1/sqrt(fan_in), 1/sqrt(fan_in)).
    ks = jax.random.split(key, 6)

    def linear(kw, kb, fan_in, fan_out):
        bound = 1.0 / jnp.sqrt(jnp.float32(fan_in))
        w = jax.random.uniform(kw, (fan_in, fan_out), jnp.float32, -bound, bound)
        b = jax.random.uniform(kb, (1, fan_out), jnp.float32, -bound, bound)
        return w, b

    w1, b1 = linear(ks[0], ks[1], state_dim, hidden)
    w2, b2 = linear(ks[2], ks[3], hidden, hidden)
    w3, b3 = linear(ks[4], ks[5], hidden, action_dim)
    return (w1, b1, w2, b2, w3, b3)


def dqn_reference_kernel_numerics(x, params):
    # Mirrors the kernel's numerics exactly: bf16 activations/weights on the MXU,
    # f32 accumulation/bias/ReLU, final bf16 round of the output.
    w1, b1, w2, b2, w3, b3 = params
    w1b, w2b, w3b = (w.astype(jnp.bfloat16) for w in (w1, w2, w3))
    h1 = jnp.maximum(
        jnp.dot(x.astype(jnp.bfloat16), w1b, preferred_element_type=jnp.float32) + b1, 0.0)
    h2 = jnp.maximum(
        jnp.dot(h1.astype(jnp.bfloat16), w2b, preferred_element_type=jnp.float32) + b2, 0.0)
    q = jnp.dot(h2.astype(jnp.bfloat16), w3b, preferred_element_type=jnp.float32) + b3
    return q.astype(jnp.bfloat16).astype(jnp.float32)


def dqn_reference_f32(x, params):
    w1, b1, w2, b2, w3, b3 = params
    h1 = jnp.maximum(x @ w1 + b1, 0.0)
    h2 = jnp.maximum(h1 @ w2 + b2, 0.0)
    return h2 @ w3 + b3


if __name__ == "__main__":
    key = jax.random.PRNGKey(0)
    k_params, k_x = jax.random.split(key)

    state_dim, action_dim = 18, 5
    params = init_params(k_params, state_dim=state_dim, action_dim=action_dim)

    # batch=8 exercises the single-tile path (with row padding to 16);
    # batch=40 exercises multi-tile grid (2 tiles) + padded tail rows.
    for batch in (8, 40):
        kx = jax.random.fold_in(k_x, batch)
        x = jax.random.normal(kx, (batch, state_dim), jnp.float32)

        out = jax.block_until_ready(dqn_forward(x, params))
        ref_kernel = dqn_reference_kernel_numerics(x, params)
        ref_f32 = dqn_reference_f32(x, params)

        assert out.shape == (batch, action_dim)
        # Tight check against a reference using the kernel's exact numerics
        # (bf16 MXU operands, f32 accumulation, bf16 output round).
        assert jnp.allclose(out, ref_kernel, atol=5e-3, rtol=5e-3), (
            float(jnp.max(jnp.abs(out - ref_kernel))))
        # Coarse check that bf16 quantization keeps PyTorch-f32 semantics.
        assert jnp.allclose(out, ref_f32, atol=1e-1, rtol=1e-1), (
            float(jnp.max(jnp.abs(out - ref_f32))))

    print("KERNEL_OK")
</pallas_src>

<mosaic_0001>
module attributes {stable_mosaic.version = 11 : i64} {
  func.func @dqn_kernel(%arg0: i32, %arg1: memref<16x18xbf16, #tpu.memory_space<vmem>>, %arg2: memref<18x256xbf16, #tpu.memory_space<vmem>>, %arg3: memref<1x256xf32, #tpu.memory_space<vmem>>, %arg4: memref<256x256xbf16, #tpu.memory_space<vmem>>, %arg5: memref<1x256xf32, #tpu.memory_space<vmem>>, %arg6: memref<256x128xbf16, #tpu.memory_space<vmem>>, %arg7: memref<1x128xf32, #tpu.memory_space<vmem>>, %arg8: memref<16x128xbf16, #tpu.memory_space<vmem>>) attributes {dimension_semantics = [#tpu.dimension_semantics<parallel>], iteration_bounds = array<i64: 1>, scalar_prefetch = 0 : i64, scratch_operands = 0 : i64, tpu.core_type = #tpu.core_type<tc>, window_params = [{transform_indices = @transform_0, window_bounds = array<i64: 16, 18>}, {pipeline_mode = #tpu.pipeline_mode<synchronous>, transform_indices = @transform_1, window_bounds = array<i64: 18, 256>}, {pipeline_mode = #tpu.pipeline_mode<synchronous>, transform_indices = @transform_2, window_bounds = array<i64: 1, 256>}, {pipeline_mode = #tpu.pipeline_mode<synchronous>, transform_indices = @transform_3, window_bounds = array<i64: 256, 256>}, {pipeline_mode = #tpu.pipeline_mode<synchronous>, transform_indices = @transform_4, window_bounds = array<i64: 1, 256>}, {pipeline_mode = #tpu.pipeline_mode<synchronous>, transform_indices = @transform_5, window_bounds = array<i64: 256, 128>}, {pipeline_mode = #tpu.pipeline_mode<synchronous>, transform_indices = @transform_6, window_bounds = array<i64: 1, 128>}, {transform_indices = @transform_7, window_bounds = array<i64: 16, 128>}]} {
    %c0 = arith.constant 0 : index
    %c0_0 = arith.constant 0 : index
    %0 = vector.load %arg1[%c0, %c0_0] : memref<16x18xbf16, #tpu.memory_space<vmem>>, vector<16x18xbf16>
    %c0_1 = arith.constant 0 : index
    %c0_2 = arith.constant 0 : index
    %1 = vector.load %arg2[%c0_1, %c0_2] : memref<18x256xbf16, #tpu.memory_space<vmem>>, vector<18x256xbf16>
    %cst = arith.constant dense<0.000000e+00> : vector<16x256xf32>
    %2 = tpu.matmul %0, %1, %cst {dimension_numbers = #tpu.dot_dimension_numbers<[1], [0], [0], [1], [0, 0, 1, 1], [], []>} : vector<16x18xbf16>, vector<18x256xbf16>, vector<16x256xf32> -> vector<16x256xf32>
    %c0_3 = arith.constant 0 : index
    %c0_4 = arith.constant 0 : index
    %3 = vector.load %arg3[%c0_3, %c0_4] : memref<1x256xf32, #tpu.memory_space<vmem>>, vector<1x256xf32>
    %4 = vector.broadcast %3 : vector<1x256xf32> to vector<16x256xf32>
    %5 = arith.addf %2, %4 : vector<16x256xf32>
    %cst_5 = arith.constant 0.000000e+00 : f32
    %6 = vector.broadcast %cst_5 : f32 to vector<16x256xf32>
    %7 = arith.maximumf %5, %6 : vector<16x256xf32>
    %8 = arith.truncf %7 : vector<16x256xf32> to vector<16x256xbf16>
    %c0_6 = arith.constant 0 : index
    %c0_7 = arith.constant 0 : index
    %9 = vector.load %arg4[%c0_6, %c0_7] : memref<256x256xbf16, #tpu.memory_space<vmem>>, vector<256x256xbf16>
    %cst_8 = arith.constant dense<0.000000e+00> : vector<16x256xf32>
    %10 = tpu.matmul %8, %9, %cst_8 {dimension_numbers = #tpu.dot_dimension_numbers<[1], [0], [0], [1], [0, 0, 1, 1], [], []>} : vector<16x256xbf16>, vector<256x256xbf16>, vector<16x256xf32> -> vector<16x256xf32>
    %c0_9 = arith.constant 0 : index
    %c0_10 = arith.constant 0 : index
    %11 = vector.load %arg5[%c0_9, %c0_10] : memref<1x256xf32, #tpu.memory_space<vmem>>, vector<1x256xf32>
    %12 = vector.broadcast %11 : vector<1x256xf32> to vector<16x256xf32>
    %13 = arith.addf %10, %12 : vector<16x256xf32>
    %cst_11 = arith.constant 0.000000e+00 : f32
    %14 = vector.broadcast %cst_11 : f32 to vector<16x256xf32>
    %15 = arith.maximumf %13, %14 : vector<16x256xf32>
    %16 = arith.truncf %15 : vector<16x256xf32> to vector<16x256xbf16>
    %c0_12 = arith.constant 0 : index
    %c0_13 = arith.constant 0 : index
    %17 = vector.load %arg6[%c0_12, %c0_13] : memref<256x128xbf16, #tpu.memory_space<vmem>>, vector<256x128xbf16>
    %cst_14 = arith.constant dense<0.000000e+00> : vector<16x128xf32>
    %18 = tpu.matmul %16, %17, %cst_14 {dimension_numbers = #tpu.dot_dimension_numbers<[1], [0], [0], [1], [0, 0, 1, 1], [], []>} : vector<16x256xbf16>, vector<256x128xbf16>, vector<16x128xf32> -> vector<16x128xf32>
    %c0_15 = arith.constant 0 : index
    %c0_16 = arith.constant 0 : index
    %19 = vector.load %arg7[%c0_15, %c0_16] : memref<1x128xf32, #tpu.memory_space<vmem>>, vector<1x128xf32>
    %20 = vector.broadcast %19 : vector<1x128xf32> to vector<16x128xf32>
    %21 = arith.addf %18, %20 : vector<16x128xf32>
    %22 = arith.truncf %21 : vector<16x128xf32> to vector<16x128xbf16>
    %c0_17 = arith.constant 0 : index
    %c0_18 = arith.constant 0 : index
    %23 = vector.load %arg8[%c0_17, %c0_18] : memref<16x128xbf16, #tpu.memory_space<vmem>>, vector<16x128xbf16>
    tpu.vector_store %arg8[%c0_17, %c0_18], %22 {strides = array<i32>} : memref<16x128xbf16, #tpu.memory_space<vmem>>, vector<16x128xbf16>,
    return
  }
  func.func @transform_0(%arg0: i32) -> (i32, i32) {
    %c0_i32 = arith.constant 0 : i32
    %c0_i32_0 = arith.constant 0 : i32
    return %arg0, %c0_i32 : i32, i32
  }
  func.func @transform_1(%arg0: i32) -> (i32, i32) {
    %c0_i32 = arith.constant 0 : i32
    %c0_i32_0 = arith.constant 0 : i32
    %c0_i32_1 = arith.constant 0 : i32
    return %c0_i32, %c0_i32_0 : i32, i32
  }
  func.func @transform_2(%arg0: i32) -> (i32, i32) {
    %c0_i32 = arith.constant 0 : i32
    %c0_i32_0 = arith.constant 0 : i32
    %c0_i32_1 = arith.constant 0 : i32
    return %c0_i32, %c0_i32_0 : i32, i32
  }
  func.func @transform_3(%arg0: i32) -> (i32, i32) {
    %c0_i32 = arith.constant 0 : i32
    %c0_i32_0 = arith.constant 0 : i32
    %c0_i32_1 = arith.constant 0 : i32
    return %c0_i32, %c0_i32_0 : i32, i32
  }
  func.func @transform_4(%arg0: i32) -> (i32, i32) {
    %c0_i32 = arith.constant 0 : i32
    %c0_i32_0 = arith.constant 0 : i32
    %c0_i32_1 = arith.constant 0 : i32
    return %c0_i32, %c0_i32_0 : i32, i32
  }
  func.func @transform_5(%arg0: i32) -> (i32, i32) {
    %c0_i32 = arith.constant 0 : i32
    %c0_i32_0 = arith.constant 0 : i32
    %c0_i32_1 = arith.constant 0 : i32
    return %c0_i32, %c0_i32_0 : i32, i32
  }
  func.func @transform_6(%arg0: i32) -> (i32, i32) {
    %c0_i32 = arith.constant 0 : i32
    %c0_i32_0 = arith.constant 0 : i32
    %c0_i32_1 = arith.constant 0 : i32
    return %c0_i32, %c0_i32_0 : i32, i32
  }
  func.func @transform_7(%arg0: i32) -> (i32, i32) {
    %c0_i32 = arith.constant 0 : i32
    %c0_i32_0 = arith.constant 0 : i32
    return %arg0, %c0_i32 : i32, i32
  }
}

</mosaic_0001>

<bundles_post_ra>
// kernel: dqn_forward.1
= control target key start
LH: loop header
LB: loop body
LE: loop exit
PB: predicated region body
PF: predicated region fallthrough
CT: control target
= control target key end

     0   :  { %vm62_vm0 = vcmask 1040384   ;;  %vm58_vm1 = vcmask 146432   ;;  %s1106_s1 = inlined_call_operand.vmem [shape: bf16[18,256], index: 1, kind: input, shape index: {}]   ;;  %s1107_s3 = inlined_call_operand.vmem [shape: bf16[256,256], index: 3, kind: input, shape index: {}]   ;;  %s1108_s0 = inlined_call_operand.vmem [shape: bf16[16,18], index: 0, kind: input, shape index: {}]   ;;  %s1109_s5 = inlined_call_operand.vmem [shape: bf16[256,128], index: 5, kind: input, shape index: {}]   ;;  %s1110_s2 = inlined_call_operand.vmem [shape: f32[1,256], index: 2, kind: input, shape index: {}]   ;;  %s1111_s4 = inlined_call_operand.vmem [shape: f32[1,256], index: 4, kind: input, shape index: {}]   ;;  %s1112_s6 = inlined_call_operand.vmem [shape: f32[1,128], index: 6, kind: input, shape index: {}]   ;;  %s1113_s7 = inlined_call_operand.vmem [shape: bf16[16,128], index: 7, kind: output, shape index: {}]  }
   0x1   :  { %v31_v0 = vld [vmem:[%s1106_s1 + $0x10] sm:$0x11]  ;;  %v537_v3 = vld [vmem:[%s1106_s1] sm:$0xf]  ;;  %v739_v4 = vld [vmem:[%s1106_s1 + $0x4] sm:$0xf0] }
   0x2   :  { %v50_v1 = vunpack.c.l.b16 %v31_v0  ;;  %v51_v2 = vunpack.c.h.b16 %v31_v0  ;;  %v738_v5 = vld [vmem:[%s1106_s1 + $0x4] sm:$0xf]  ;;  %v539_v6 = vld [vmem:[%s1106_s1 + $0x8] sm:$0xf0]  ;;  %v603_v7 = vld [vmem:[%s1107_s3 + $0x70] sm:$0xf]  ;;  %v538_v24 = vor.u32 %v739_v4, %v537_v3 }
   0x3   :  { %v755_v8 = vld [vmem:[%s1107_s3 + $0x74] sm:$0xf0]  ;;  %v667_v9 = vld [vmem:[%s1107_s3 + $0xf0] sm:$0xf]  ;;  %v754_v14 = vld [vmem:[%s1107_s3 + $0x74] sm:$0xf]  ;;  %v542_v25 = vor.u32 %v738_v5, %v539_v6 }
   0x4   :  { %v54_v10 = vpack.c.b16 %v50_v1, %v50_v1  ;;  %v55_v11 = vpack.c.b16 %v51_v2, %v51_v2  ;;  %v604_v12 = vor.u32 %v755_v8, %v603_v7  ;;  %v771_v13 = vld [vmem:[%s1107_s3 + $0xf4] sm:$0xf0]  ;;  %v605_v15 = vld [vmem:[%s1107_s3 + $0x78] sm:$0xf0]  ;;  %v770_v17 = vld [vmem:[%s1107_s3 + $0xf4] sm:$0xf] }
   0x5   :  { %v668_v16 = vor.u32 %v771_v13, %v667_v9  ;;  %v669_v18 = vld [vmem:[%s1107_s3 + $0xf8] sm:$0xf0]  ;;  %v595_v19 = vld [vmem:[%s1107_s3 + $0x60] sm:$0xf]  ;;  %v753_v22 = vld [vmem:[%s1107_s3 + $0x64] sm:$0xf0]  ;;  %v608_v28 = vor.u32 %v754_v14, %v605_v15 }
   0x6   :  { %v64_v20 = vsel %vm62_vm0, %v54_v10, 0  ;;  %v67_v21 = vsel %vm62_vm0, %v55_v11, 0  ;;  %301 = vmatpush.bf16.msra.mxu2 %v604_v12  ;;  %v659_v23 = vld [vmem:[%s1107_s3 + $0xe0] sm:$0xf]  ;;  %v596_v26 = vor.u32 %v753_v22, %v595_v19  ;;  %v769_v27 = vld [vmem:[%s1107_s3 + $0xe4] sm:$0xf0]  ;;  %v672_v29 = vor.u32 %v770_v17, %v669_v18 }
   0x7   :  { %75 = vmatpush.bf16.msra.mxu0 %v64_v20  ;;  %89 = vmatpush.bf16.msra.mxu1 %v67_v21  ;;  %v752_v30 = vld [vmem:[%s1107_s3 + $0x64] sm:$0xf]  ;;  %v597_v31 = vld [vmem:[%s1107_s3 + $0x68] sm:$0xf0]  ;;  %v587_v32 = vld [vmem:[%s1107_s3 + $0x50] sm:$0xf]  ;;  %v660_v33 = vor.u32 %v769_v27, %v659_v23 }
   0x8   :  { %315 = vmatpush.bf16.msra.mxu3 %v668_v16  ;;  %v768_v34 = vld [vmem:[%s1107_s3 + $0xe4] sm:$0xf]  ;;  %v661_v35 = vld [vmem:[%s1107_s3 + $0xe8] sm:$0xf0]  ;;  %v751_v36 = vld [vmem:[%s1107_s3 + $0x54] sm:$0xf0]  ;;  %v600_v41 = vor.u32 %v752_v30, %v597_v31 }
   0x9   :  { %v737_v37 = vld [vmem:[%s1108_s0] sm:$0xff]  ;;  %v651_v38 = vld [vmem:[%s1107_s3 + $0xd0] sm:$0xf]  ;;  %v767_v39 = vld [vmem:[%s1107_s3 + $0xd4] sm:$0xf0]  ;;  %v588_v40 = vor.u32 %v751_v36, %v587_v32  ;;  %v664_v42 = vor.u32 %v768_v34, %v661_v35 }
   0xa   :  { %302 = vmatpush.bf16.msra.mxu2 %v596_v26  ;;  %v750_v43 = vld [vmem:[%s1107_s3 + $0x54] sm:$0xf]  ;;  %v579_v44 = vld [vmem:[%s1107_s3 + $0x40] sm:$0xf]  ;;  %v749_v45 = vld [vmem:[%s1107_s3 + $0x44] sm:$0xf0]  ;;  %v652_v46 = vor.u32 %v767_v39, %v651_v38 }
   0xb   :  { %76 = vmatpush.bf16.msra.mxu0 %v538_v24  ;;  %90 = vmatpush.bf16.msra.mxu1 %v542_v25  ;;  %v589_v47 = vld [vmem:[%s1107_s3 + $0x58] sm:$0xf0]  ;;  %v766_v48 = vld [vmem:[%s1107_s3 + $0xd4] sm:$0xf]  ;;  %v643_v50 = vld [vmem:[%s1107_s3 + $0xc0] sm:$0xf]  ;;  %v580_v52 = vor.u32 %v749_v45, %v579_v44 }
   0xc   :  { %316 = vmatpush.bf16.msra.mxu3 %v660_v33  ;;  %v653_v49 = vld [vmem:[%s1107_s3 + $0xd8] sm:$0xf0]  ;;  %v765_v51 = vld [vmem:[%s1107_s3 + $0xc4] sm:$0xf0]  ;;  %v592_v53 = vor.u32 %v750_v43, %v589_v47  ;;  %v748_v55 = vld [vmem:[%s1107_s3 + $0x44] sm:$0xf] }
   0xd   :  { %v656_v54 = vor.u32 %v766_v48, %v653_v49  ;;  %v644_v56 = vor.u32 %v765_v51, %v643_v50  ;;  %v581_v57 = vld [vmem:[%s1107_s3 + $0x48] sm:$0xf0]  ;;  %v764_v58 = vld [vmem:[%s1107_s3 + $0xc4] sm:$0xf]  ;;  %v571_v62 = vld [vmem:[%s1107_s3 + $0x30] sm:$0xf] }
   0xe   :  { %543 = vmatmul.msk.bf16.vlgmr.msra.gmra.mxu0 %vm58_vm1, %v737_v37  ;;  %544 = vmatmul.msk.bf16.vlgmr.msra.gmra.mxu1 %vm58_vm1, %v737_v37  ;;  %v645_v59 = vld [vmem:[%s1107_s3 + $0xc8] sm:$0xf0]  ;;  %v584_v60 = vor.u32 %v748_v55, %v581_v57  ;;  %v747_v63 = vld [vmem:[%s1107_s3 + $0x34] sm:$0xf0]  ;;  %v635_v0 = vld [vmem:[%s1107_s3 + $0xb0] sm:$0xf] }
   0xf   :  { %329 = vmatpush.bf16.msrb.mxu0 %v608_v28  ;;  %343 = vmatpush.bf16.msrb.mxu1 %v672_v29  ;;  %v648_v61 = vor.u32 %v764_v58, %v645_v59  ;;  %v572_v1 = vor.u32 %v747_v63, %v571_v62  ;;  %v763_v2 = vld [vmem:[%s1107_s3 + $0xb4] sm:$0xf0]  ;;  %v746_v3 = vld [vmem:[%s1107_s3 + $0x34] sm:$0xf]  ;;  %v573_v4 = vld [vmem:[%s1107_s3 + $0x38] sm:$0xf0] }
  0x10   :  { %303 = vmatpush.bf16.msra.mxu2 %v588_v40  ;;  %317 = vmatpush.bf16.msra.mxu3 %v652_v46  ;;  %v636_v5 = vor.u32 %v763_v2, %v635_v0  ;;  %v576_v6 = vor.u32 %v746_v3, %v573_v4  ;;  %v762_v7 = vld [vmem:[%s1107_s3 + $0xb4] sm:$0xf]  ;;  %v637_v8 = vld [vmem:[%s1107_s3 + $0xb8] sm:$0xf0]  ;;  %v563_v10 = vld [vmem:[%s1107_s3 + $0x20] sm:$0xf] }
  0x11   :  { %v640_v9 = vor.u32 %v762_v7, %v637_v8  ;;  %v745_v11 = vld [vmem:[%s1107_s3 + $0x24] sm:$0xf0]  ;;  %v627_v13 = vld [vmem:[%s1107_s3 + $0xa0] sm:$0xf]  ;;  %v744_v15 = vld [vmem:[%s1107_s3 + $0x24] sm:$0xf] }
  0x12   :  { %v564_v12 = vor.u32 %v745_v11, %v563_v10  ;;  %v761_v14 = vld [vmem:[%s1107_s3 + $0xa4] sm:$0xf0]  ;;  %v565_v17 = vld [vmem:[%s1107_s3 + $0x28] sm:$0xf0]  ;;  %v760_v18 = vld [vmem:[%s1107_s3 + $0xa4] sm:$0xf] }
  0x13   :  { %330 = vmatpush.bf16.msrb.mxu0 %v600_v41  ;;  %344 = vmatpush.bf16.msrb.mxu1 %v664_v42  ;;  %v628_v16 = vor.u32 %v761_v14, %v627_v13  ;;  %v629_v19 = vld [vmem:[%s1107_s3 + $0xa8] sm:$0xf0]  ;;  %v568_v20 = vor.u32 %v744_v15, %v565_v17  ;;  %v555_v22 = vld [vmem:[%s1107_s3 + $0x10] sm:$0xf]  ;;  %v743_v23 = vld [vmem:[%s1107_s3 + $0x14] sm:$0xf0] }
  0x14   :  { %304 = vmatpush.bf16.msra.mxu2 %v580_v52  ;;  %318 = vmatpush.bf16.msra.mxu3 %v644_v56  ;;  %v632_v21 = vor.u32 %v760_v18, %v629_v19  ;;  %v619_v24 = vld [vmem:[%s1107_s3 + $0x90] sm:$0xf]  ;;  %v556_v25 = vor.u32 %v743_v23, %v555_v22  ;;  %v759_v26 = vld [vmem:[%s1107_s3 + $0x94] sm:$0xf0]  ;;  %v742_v27 = vld [vmem:[%s1107_s3 + $0x14] sm:$0xf] }
  0x15   :  { %v557_v28 = vld [vmem:[%s1107_s3 + $0x18] sm:$0xf0]  ;;  %v620_v29 = vor.u32 %v759_v26, %v619_v24  ;;  %v758_v31 = vld [vmem:[%s1107_s3 + $0x94] sm:$0xf]  ;;  %v547_v34 = vld [vmem:[%s1107_s3] sm:$0xf] }
  0x16   :  { %v560_v30 = vor.u32 %v742_v27, %v557_v28  ;;  %v621_v32 = vld [vmem:[%s1107_s3 + $0x98] sm:$0xf0]  ;;  %v741_v35 = vld [vmem:[%s1107_s3 + $0x4] sm:$0xf0]  ;;  %v611_v36 = vld [vmem:[%s1107_s3 + $0x80] sm:$0xf] }
  0x17   :  { %331 = vmatpush.bf16.msrb.mxu0 %v592_v53  ;;  %345 = vmatpush.bf16.msrb.mxu1 %v656_v54  ;;  %v624_v33 = vor.u32 %v758_v31, %v621_v32  ;;  %v548_v37 = vor.u32 %v741_v35, %v547_v34  ;;  %v757_v38 = vld [vmem:[%s1107_s3 + $0x84] sm:$0xf0]  ;;  %v740_v39 = vld [vmem:[%s1107_s3 + $0x4] sm:$0xf]  ;;  %v549_v40 = vld [vmem:[%s1107_s3 + $0x8] sm:$0xf0] }
  0x18   :  { %305 = vmatpush.bf16.msra.mxu2 %v572_v1  ;;  %319 = vmatpush.bf16.msra.mxu3 %v636_v5  ;;  %v612_v41 = vor.u32 %v757_v38, %v611_v36  ;;  %v552_v42 = vor.u32 %v740_v39, %v549_v40  ;;  %v756_v43 = vld [vmem:[%s1107_s3 + $0x84] sm:$0xf]  ;;  %v613_v44 = vld [vmem:[%s1107_s3 + $0x88] sm:$0xf0]  ;;  %v787_v46 = vld [vmem:[%s1109_s5 + $0x78] sm:$0xff] }
  0x19   :  { %v616_v45 = vor.u32 %v756_v43, %v613_v44  ;;  %v779_v47 = vld [vmem:[%s1109_s5 + $0x38] sm:$0xff]  ;;  %v786_v48 = vld [vmem:[%s1109_s5 + $0x70] sm:$0xff]  ;;  %v785_v50 = vld [vmem:[%s1109_s5 + $0x68] sm:$0xff] }
  0x1a   :  { %v778_v49 = vld [vmem:[%s1109_s5 + $0x30] sm:$0xff]  ;;  %v784_v51 = vld [vmem:[%s1109_s5 + $0x60] sm:$0xff]  ;;  %v777_v5 = vld [vmem:[%s1109_s5 + $0x28] sm:$0xff] }
  0x1b   :  { %332 = vmatpush.bf16.msrb.mxu0 %v584_v60  ;;  %346 = vmatpush.bf16.msrb.mxu1 %v648_v61  ;;  %v32_v52 = vld [vmem:[%s1110_s2] sm:$0x3]  ;;  %v782_v8 = vld [vmem:[%s1109_s5 + $0x50] sm:$0xff]  ;;  %v781_v10 = vld [vmem:[%s1109_s5 + $0x48] sm:$0xff] }
  0x1c   :  { %306 = vmatpush.bf16.msra.mxu2 %v564_v12  ;;  %320 = vmatpush.bf16.msra.mxu3 %v628_v16  ;;  %v34_v55 = vperm.slane %v32_v52, 0  ;;  %v35_v56 = vperm.slane %v32_v52, 1  ;;  %v776_v7 = vld [vmem:[%s1109_s5 + $0x20] sm:$0xff]  ;;  %v774_v11 = vld [vmem:[%s1109_s5 + $0x10] sm:$0xff]  ;;  %v773_v13 = vld [vmem:[%s1109_s5 + $0x8] sm:$0xff] }
  0x1d   :  { %v780_v12 = vld [vmem:[%s1109_s5 + $0x40] sm:$0xff] }
  0x1e   :  { %v772_v14 = vld [vmem:[%s1109_s5] sm:$0xff] }
  0x1f   :  { %333 = vmatpush.bf16.msrb.mxu0 %v576_v6  ;;  %347 = vmatpush.bf16.msrb.mxu1 %v640_v9  ;;  %v783_v6 = vld [vmem:[%s1109_s5 + $0x58] sm:$0xff]  ;;  %v135_v15 = vld [vmem:[%s1111_s4] sm:$0x3] }
  0x20   :  { %307 = vmatpush.bf16.msra.mxu2 %v556_v25  ;;  %321 = vmatpush.bf16.msra.mxu3 %v620_v29  ;;  %v775_v9 = vld [vmem:[%s1109_s5 + $0x18] sm:$0xff]  ;;  %v138_v18 = vperm.slane %v135_v15, 1  ;;  %v137_v22 = vperm.slane %v135_v15, 0 }
  0x23   :  { %334 = vmatpush.bf16.msrb.mxu0 %v568_v20  ;;  %348 = vmatpush.bf16.msrb.mxu1 %v632_v21 }
  0x24   :  { %308 = vmatpush.bf16.msra.mxu2 %v548_v37  ;;  %322 = vmatpush.bf16.msra.mxu3 %v612_v41 }
  0x27   :  { %335 = vmatpush.bf16.msrb.mxu0 %v560_v30  ;;  %349 = vmatpush.bf16.msrb.mxu1 %v624_v33 }
  0x28   :  { %509 = vmatpush.bf16.msrb.mxu3 %v787_v46  ;;  %495 = vmatpush.bf16.msrb.mxu2 %v779_v47 }
  0x2b   :  { %336 = vmatpush.bf16.msrb.mxu0 %v552_v42  ;;  %350 = vmatpush.bf16.msrb.mxu1 %v616_v45  ;;  %v793_v42 = vld [vmem:[%s1112_s6] ss:$0 sm:$0xff] }
  0x2c   :  { %510 = vmatpush.bf16.msrb.mxu3 %v786_v48  ;;  %496 = vmatpush.bf16.msrb.mxu2 %v778_v49 }
  0x30   :  { %511 = vmatpush.bf16.msrb.mxu3 %v785_v50  ;;  %497 = vmatpush.bf16.msrb.mxu2 %v777_v5 }
  0x34   :  { %512 = vmatpush.bf16.msrb.mxu3 %v784_v51  ;;  %498 = vmatpush.bf16.msrb.mxu2 %v776_v7 }
  0x38   :  { %513 = vmatpush.bf16.msrb.mxu3 %v783_v6  ;;  %499 = vmatpush.bf16.msrb.mxu2 %v775_v9 }
  0x3c   :  { %514 = vmatpush.bf16.msrb.mxu3 %v782_v8  ;;  %500 = vmatpush.bf16.msrb.mxu2 %v774_v11 }
  0x40   :  { %515 = vmatpush.bf16.msrb.mxu3 %v781_v10  ;;  %501 = vmatpush.bf16.msrb.mxu2 %v773_v13 }
  0x44   :  { %516 = vmatpush.bf16.msrb.mxu3 %v780_v12  ;;  %502 = vmatpush.bf16.msrb.mxu2 %v772_v14 }
  0x8b   :  { %v78_v53 = vpop.f32.mrf.mxu0  ;;  %v92_v54 = vpop.f32.mrf.mxu1 }
  0x8c   :  { %v79_v57 = vadd.f32 %v78_v53, %v34_v55  ;;  %v93_v58 = vadd.f32 %v92_v54, %v35_v56 }
  0x8e   :  { %v97_v63 = vmax.f32 %v79_v57, 0.0  ;;  %v98_v0 = vmax.f32 %v93_v58, 0.0 }
  0x93   :  { %v80_v59 = vpop.f32.mrf.mxu0  ;;  %v94_v60 = vpop.f32.mrf.mxu1 }
  0x94   :  { %v81_v61 = vadd.f32 %v80_v59, %v34_v55  ;;  %v95_v62 = vadd.f32 %v94_v60, %v35_v56 }
  0x96   :  { %v99_v1 = vmax.f32 %v81_v61, 0.0  ;;  %v100_v2 = vmax.f32 %v95_v62, 0.0 }
  0x98   :  { %v101_v3 = vpack.c.bf16 %v99_v1, %v97_v63  ;;  %v102_v4 = vpack.c.bf16 %v100_v2, %v98_v0 }
  0x9a   :  { %309 = vmatmul.bf16.vlgmr.msra.gmra.mxu2 %v101_v3  ;;  %323 = vmatmul.bf16.vlgmr.msra.gmra.mxu3 %v102_v4 }
  0x9b   :  { %337 = vmatmul.bf16.vlgmr.msrb.gmra.mxu0 %v101_v3  ;;  %351 = vmatmul.bf16.vlgmr.msrb.gmra.mxu1 %v102_v4 }
 0x118   :  { %v338_v16 = vpop.f32.mrf.mxu0  ;;  %v352_v17 = vpop.f32.mrf.mxu1 }
 0x119   :  { %v339_v19 = vadd.f32 %v338_v16, %v138_v18 }
 0x11b   :  { %v353_v24 = vadd.f32 %v352_v17, %v339_v19 }
 0x11d   :  { %v310_v20 = vpop.f32.mrf.mxu2  ;;  %v324_v21 = vpop.f32.mrf.mxu3  ;;  %v358_v29 = vmax.f32 %v353_v24, 0.0 }
 0x11e   :  { %v311_v26 = vadd.f32 %v310_v20, %v137_v22 }
 0x120   :  { %v340_v23 = vpop.f32.mrf.mxu0  ;;  %v354_v27 = vpop.f32.mrf.mxu1  ;;  %v325_v32 = vadd.f32 %v324_v21, %v311_v26 }
 0x121   :  { %v341_v25 = vadd.f32 %v340_v23, %v138_v18 }
 0x122   :  { %v357_v37 = vmax.f32 %v325_v32, 0.0 }
 0x123   :  { %v355_v28 = vadd.f32 %v354_v27, %v341_v25 }
 0x125   :  { %v360_v30 = vmax.f32 %v355_v28, 0.0  ;;  %v312_v31 = vpop.f32.mrf.mxu2  ;;  %v326_v35 = vpop.f32.mrf.mxu3 }
 0x126   :  { %v313_v33 = vadd.f32 %v312_v31, %v137_v22 }
 0x127   :  { %v362_v34 = vpack.c.bf16 %v360_v30, %v358_v29 }
 0x128   :  { %v327_v36 = vadd.f32 %v326_v35, %v313_v33 }
 0x129   :  { %517 = vmatmul.bf16.vlgmr.msrb.gmra.mxu3 %v362_v34 }
 0x12a   :  { %v359_v38 = vmax.f32 %v327_v36, 0.0 }
 0x12c   :  { %v361_v39 = vpack.c.bf16 %v359_v38, %v357_v37 }
 0x12e   :  { %503 = vmatmul.bf16.vlgmr.msrb.gmra.mxu2 %v361_v39 }
 0x1ac   :  { %v518_v40 = vpop.f32.mrf.mxu3 }
 0x1b1   :  { %v504_v41 = vpop.f32.mrf.mxu2 }
 0x1b2   :  { %v505_v43 = vadd.f32 %v793_v42, %v504_v41 }
 0x1b4   :  { %v520_v46 = vpop.f32.mrf.mxu3  ;;  %v519_v47 = vadd.f32 %v518_v40, %v505_v43 }
 0x1b9   :  { %v506_v44 = vpop.f32.mrf.mxu2 }
 0x1ba   :  { %v507_v45 = vadd.f32 %v793_v42, %v506_v44 }
 0x1bc   :  { %v521_v48 = vadd.f32 %v520_v46, %v507_v45 }
 0x1be   :  { %v791_v49 = vpack.c.bf16 %v521_v48, %v519_v47 }
 0x1c0   :  { %792 = vst [vmem:[%s1113_s7] sm:$0xff] %v791_v49  }

</bundles_post_ra>
